<compile_context>
chip_gen: v7x
topology: tpu7x:2x2x1
jax: 0.10.0
libtpu: 0.0.40
codegen_flags: <defaults>
</compile_context>

<pallas_src>
import math

import jax
import jax.numpy as jnp
from jax.experimental import pallas as pl
from jax.experimental.pallas import tpu as pltpu


# ----------------------------------------------------------------------------
# Kernel body (pure VPU FMA, broadcast over the row tile).
# ----------------------------------------------------------------------------
def _affine_kernel(x_ref, a_ref, b_ref, o_ref):
    # x_ref: (ts, L); a_ref/b_ref: (1, L) broadcast over rows.
    o_ref[...] = x_ref[...] * a_ref[...] + b_ref[...]


# ----------------------------------------------------------------------------
# Wrapper: apply o = x * a + b with per-feature vectors a, b of shape [D].
# ----------------------------------------------------------------------------
def _apply_affine(x, a_vec, b_vec, target_tile_bytes=2 << 20):
    orig_shape = x.shape
    dtype = x.dtype
    D = orig_shape[-1]

    # Module semantics: stats are cast to x.dtype before the arithmetic.
    a_vec = a_vec.astype(dtype)
    b_vec = b_vec.astype(dtype)

    # Lane-dense last dim: L = lcm(D, 128) so stores are unmasked full-lane.
    if D % 128 == 0:
        L = D
    else:
        L = (D * 128) // math.gcd(D, 128)  # lcm(D, 128)

    total = x.size
    x_flat = x.reshape(-1)
    pad_elems = (-total) % L
    if pad_elems:
        # One-time flat pad so the slab stays lane-dense; tail rows are
        # computed on zeros and sliced off afterwards (never hit for typical
        # shapes where batch*seq*D is a multiple of 128).
        x_flat = jnp.concatenate(
            [x_flat, jnp.zeros((pad_elems,), dtype=dtype)])

    rows = x_flat.size // L
    reps = L // D
    x2d = x_flat.reshape(rows, L)
    a_L = jnp.tile(a_vec, reps).reshape(1, L)
    b_L = jnp.tile(b_vec, reps).reshape(1, L)

    itemsize = jnp.dtype(dtype).itemsize
    sublane = 8 * max(1, 4 // itemsize)  # 8 (f32), 16 (bf16), 32 (int8/fp8)

    # ~2 MiB row tiles: 2x(in) + 2x(out) double-buffered tiles = 8 MiB, which
    # fits the default scoped VMEM on v5e/v6e/v7x with headroom, and is well
    # past the ~85% HBM-roofline knee.
    ts = target_tile_bytes // (L * itemsize)
    ts = max(sublane, (ts // sublane) * sublane)

    # v7x megacore: cap the tile so the "parallel" row axis has >= 4 grid
    # steps whenever there are enough rows to split.
    quarter = ((rows // 4) // sublane) * sublane
    if quarter >= sublane:
        ts = min(ts, quarter)

    if ts >= rows:
        ts = rows  # single block equal to the full extent (always legal)

    grid = (pl.cdiv(rows, ts),)  # ragged last block: Pallas masks the writes

    out = pl.pallas_call(
        _affine_kernel,
        out_shape=jax.ShapeDtypeStruct((rows, L), dtype),
        grid_spec=pl.GridSpec(
            grid=grid,
            in_specs=[
                pl.BlockSpec((ts, L), lambda i: (i, 0)),
                pl.BlockSpec((1, L), lambda i: (0, 0)),
                pl.BlockSpec((1, L), lambda i: (0, 0)),
            ],
            out_specs=pl.BlockSpec((ts, L), lambda i: (i, 0)),
        ),
        compiler_params=pltpu.CompilerParams(
            dimension_semantics=("parallel",),
        ),
    )(x2d, a_L, b_L)

    out_flat = out.reshape(-1)
    if pad_elems:
        out_flat = out_flat[:total]
    return out_flat.reshape(orig_shape)


# ----------------------------------------------------------------------------
# Module-level forward passes.
# ----------------------------------------------------------------------------
def series_encode(x, mean_input, std_input):
    """(x - mean_input) / std_input, folded to x * (1/std) + (-mean/std)."""
    inv_std = 1.0 / std_input.astype(jnp.float32)
    a = inv_std
    b = -mean_input.astype(jnp.float32) * inv_std
    return _apply_affine(x, a, b)


def series_decode(x, mean_output, std_output):
    """x * std_output + mean_output."""
    return _apply_affine(x, std_output, mean_output)


def deploy_forward(x, mean_input, std_input, mean_output, std_output,
                   model_fn=None):
    """Pallas equivalent of deploy.forward: encode -> model -> decode.

    When model_fn is None (identity inner model) the two affines are folded
    into a single fused pass over x (one HBM read + one write instead of two).
    """
    if model_fn is None:
        si = std_input.astype(jnp.float32)
        scale = std_output.astype(jnp.float32) / si
        shift = mean_output.astype(jnp.float32) - mean_input.astype(
            jnp.float32) * scale
        return _apply_affine(x, scale, shift)

    # TODO(synk): the inner `model` is an arbitrary user-supplied network with
    # no fixed definition in the spec; accept it as a JAX callable rather than
    # faking a particular architecture.
    x = series_encode(x, mean_input, std_input)
    x = model_fn(x)
    x = series_decode(x, mean_output, std_output)
    return x


if __name__ == "__main__":
    key = jax.random.PRNGKey(0)
    kx, ksi, kmi, kso, kmo = jax.random.split(key, 5)

    # Small shapes consistent with the module: [batch, seq, hidden].
    B, S, D = 2, 8, 32
    x = jax.random.normal(kx, (B, S, D), dtype=jnp.float32)

    # Deterministic dataset statistics (the module's registered buffers),
    # synthesized in-script.
    std_input = jax.random.uniform(ksi, (D,), dtype=jnp.float32,
                                   minval=0.5, maxval=2.0)
    mean_input = jax.random.normal(kmi, (D,), dtype=jnp.float32)
    std_output = jax.random.uniform(kso, (D,), dtype=jnp.float32,
                                    minval=0.5, maxval=2.0)
    mean_output = jax.random.normal(kmo, (D,), dtype=jnp.float32)

    mi = mean_input.reshape(1, 1, D)
    si = std_input.reshape(1, 1, D)
    mo = mean_output.reshape(1, 1, D)
    so = std_output.reshape(1, 1, D)

    # 1) Identity inner model -> fused single-pass kernel.
    out_fused = jax.block_until_ready(
        deploy_forward(x, mean_input, std_input, mean_output, std_output))
    ref_fused = ((x - mi) / si) * so + mo
    assert out_fused.shape == (B, S, D)
    assert jnp.allclose(out_fused, ref_fused, atol=1e-5, rtol=1e-5)

    # 2) Non-trivial inner model -> separate encode / decode kernel passes.
    model_fn = lambda h: h * 2.0 + 1.0
    out_model = jax.block_until_ready(
        deploy_forward(x, mean_input, std_input, mean_output, std_output,
                       model_fn=model_fn))
    ref_model = (((x - mi) / si) * 2.0 + 1.0) * so + mo
    assert jnp.allclose(out_model, ref_model, atol=1e-5, rtol=1e-5)

    # 3) Decode stage on its own (exact FMA form, matches PyTorch op order).
    dec = jax.block_until_ready(series_decode(x, mean_output, std_output))
    assert jnp.allclose(dec, x * so + mo, atol=1e-6, rtol=1e-6)

    print("KERNEL_OK")
</pallas_src>

<mosaic_0001>
module attributes {stable_mosaic.version = 11 : i64} {
  func.func @_affine_kernel(%arg0: i32, %arg1: memref<4x128xf32, #tpu.memory_space<vmem>>, %arg2: memref<1x128xf32, #tpu.memory_space<vmem>>, %arg3: memref<1x128xf32, #tpu.memory_space<vmem>>, %arg4: memref<4x128xf32, #tpu.memory_space<vmem>>) attributes {dimension_semantics = [#tpu.dimension_semantics<parallel>], iteration_bounds = array<i64: 1>, scalar_prefetch = 0 : i64, scratch_operands = 0 : i64, tpu.core_type = #tpu.core_type<tc>, window_params = [{transform_indices = @transform_0, window_bounds = array<i64: 4, 128>}, {pipeline_mode = #tpu.pipeline_mode<synchronous>, transform_indices = @transform_1, window_bounds = array<i64: 1, 128>}, {pipeline_mode = #tpu.pipeline_mode<synchronous>, transform_indices = @transform_2, window_bounds = array<i64: 1, 128>}, {transform_indices = @transform_3, window_bounds = array<i64: 4, 128>}]} {
    %c0 = arith.constant 0 : index
    %c0_0 = arith.constant 0 : index
    %0 = vector.load %arg1[%c0, %c0_0] : memref<4x128xf32, #tpu.memory_space<vmem>>, vector<4x128xf32>
    %c0_1 = arith.constant 0 : index
    %c0_2 = arith.constant 0 : index
    %1 = vector.load %arg2[%c0_1, %c0_2] : memref<1x128xf32, #tpu.memory_space<vmem>>, vector<1x128xf32>
    %2 = vector.broadcast %1 : vector<1x128xf32> to vector<4x128xf32>
    %3 = arith.mulf %0, %2 : vector<4x128xf32>
    %c0_3 = arith.constant 0 : index
    %c0_4 = arith.constant 0 : index
    %4 = vector.load %arg3[%c0_3, %c0_4] : memref<1x128xf32, #tpu.memory_space<vmem>>, vector<1x128xf32>
    %5 = vector.broadcast %4 : vector<1x128xf32> to vector<4x128xf32>
    %6 = arith.addf %3, %5 : vector<4x128xf32>
    %c0_5 = arith.constant 0 : index
    %c0_6 = arith.constant 0 : index
    %7 = vector.load %arg4[%c0_5, %c0_6] : memref<4x128xf32, #tpu.memory_space<vmem>>, vector<4x128xf32>
    tpu.vector_store %arg4[%c0_5, %c0_6], %6 {strides = array<i32>} : memref<4x128xf32, #tpu.memory_space<vmem>>, vector<4x128xf32>,
    return
  }
  func.func @transform_0(%arg0: i32) -> (i32, i32) {
    %c0_i32 = arith.constant 0 : i32
    %c0_i32_0 = arith.constant 0 : i32
    return %arg0, %c0_i32 : i32, i32
  }
  func.func @transform_1(%arg0: i32) -> (i32, i32) {
    %c0_i32 = arith.constant 0 : i32
    %c0_i32_0 = arith.constant 0 : i32
    %c0_i32_1 = arith.constant 0 : i32
    return %c0_i32, %c0_i32_0 : i32, i32
  }
  func.func @transform_2(%arg0: i32) -> (i32, i32) {
    %c0_i32 = arith.constant 0 : i32
    %c0_i32_0 = arith.constant 0 : i32
    %c0_i32_1 = arith.constant 0 : i32
    return %c0_i32, %c0_i32_0 : i32, i32
  }
  func.func @transform_3(%arg0: i32) -> (i32, i32) {
    %c0_i32 = arith.constant 0 : i32
    %c0_i32_0 = arith.constant 0 : i32
    return %arg0, %c0_i32 : i32, i32
  }
}

</mosaic_0001>

<bundles_post_ra>
// kernel: tpu_custom_call.1
= control target key start
LH: loop header
LB: loop body
LE: loop exit
PB: predicated region body
PF: predicated region fallthrough
CT: control target
= control target key end

     0   :  { %8 = vsyncpa [#allocation3], 0  ;;  %s164_s0 = inlined_call_operand.hbm [shape: f32[4,128], index: 0, kind: input, shape index: {}]   ;;  %s165_s1 = inlined_call_operand.vmem [shape: f32[1,128], index: 1, kind: input, shape index: {}]   ;;  %s166_s2 = inlined_call_operand.vmem [shape: f32[1,128], index: 2, kind: input, shape index: {}]   ;;  %s167_s3 = inlined_call_operand.hbm [shape: f32[4,128], index: 3, kind: output, shape index: {}]  }
   0x1   :  { %9 = vsyncpa [#allocation4], 0  ;;  %s112_s12 = smov [#allocation2]   ;;  %s64_s16 = scalar_lea.hbm %s164_s0, 64 }
   0x2   :  { %s16_s13 = sshll.u32 %s112_s12, 4  ;;  %p65_p0 = scmp.ne.s32.totalorder %s164_s0, %s64_s16  ;;  %s17_s13 = int_to_ptr.vmem [resolvable:$true] %s16_s13 }
   0x3   :  { %p68_p1 = scmp.lt.u32.totalorder %s64_s16, %s164_s0 }
   0x5   :  { %p70_p2 = pnand %p68_p1, %p65_p0 }
   0x7   :  { %73 = shalt.err (!%p70_p2)
}
   0x8   :  { %s74_s21 = scalar_lea.vmem %s17_s13, 64  ;;  %p79_p4 = scmp.lt.s32.totalorder %s17_s13, %s17_s13 }
   0x9   :  { %p75_p3 = scmp.ne.s32.totalorder %s17_s13, %s74_s21  ;;  %p80_p5 = scmp.lt.s32.totalorder %s74_s21, %s74_s21 }
   0xb   :  { %p81_p6 = por %p80_p5, %p79_p4 }
   0xd   :  { %p82_p7 = pnand %p81_p6, %p75_p3 }
   0xf   :  { %85 = shalt.err (!%p82_p7)
}
  0x10   :  { %19 = dma.hbm_to_vmem [thread:$0]  %s164_s0, 64, %s17_s13, [#allocation3]  }
  0x11   :  { %108 = dma.done.wait [#allocation3], 64  }
  0x12   :  { %109 = vsyncadd [#allocation3], 4294967232  ;;  %s113_s24 = smov [#allocation5]   ;;  %v27_v0 = vld [vmem:[#allocation2] sm:$0xf] }
  0x13   :  { %s51_s25 = sshll.u32 %s113_s24, 4  ;;  %v60_v1 = vld [vmem:[%s165_s1] ss:$0 sm:$0xff]  ;;  %s52_s25 = int_to_ptr.vmem [resolvable:$true] %s51_s25 }
  0x14   :  { %v61_v2 = vld [vmem:[%s166_s2] ss:$0 sm:$0xff]  ;;  %v35_v3 = vmul.f32 %v60_v1, %v27_v0  ;;  %s86_s30 = scalar_lea.vmem %s52_s25, 64  ;;  %p91_p9 = scmp.lt.s32.totalorder %s52_s25, %s52_s25 }
  0x15   :  { %p87_p8 = scmp.ne.s32.totalorder %s52_s25, %s86_s30  ;;  %p92_p10 = scmp.lt.s32.totalorder %s86_s30, %s86_s30 }
  0x16   :  { %v43_v4 = vadd.f32 %v61_v2, %v35_v3 }
  0x17   :  { %p93_p11 = por %p92_p10, %p91_p9 }
  0x18   :  { %44 = vst [vmem:[#allocation5] sm:$0xf] %v43_v4 }
  0x19   :  { %p94_p12 = pnand %p93_p11, %p87_p8 }
  0x1b   :  { %97 = shalt.err (!%p94_p12)
}
  0x1c   :  { %s98_s5 = scalar_lea.hbm %s167_s3, 64 }
  0x1d   :  { %p99_p13 = scmp.ne.s32.totalorder %s167_s3, %s98_s5  ;;  %p102_p0 = scmp.lt.u32.totalorder %s98_s5, %s167_s3 }
  0x1f   :  { %p104_p1 = pnand %p102_p0, %p99_p13 }
  0x21   :  { %107 = shalt.err (!%p104_p1)
}
  0x22   :  { %54 = dma.vmem_to_hbm [thread:$0]  %s52_s25, 64, %s167_s3, [#allocation4]  }
  0x23   :  { %110 = dma.done.wait [#allocation4], 64  }
  0x24   :  { %111 = vsyncadd [#allocation4], 4294967232 }
  0x25   :  { %58 = vsyncpa [#allocation3], 1 }
  0x26   :  { %59 = vsyncpa [#allocation4], 1 }

</bundles_post_ra>
